<compile_context>
chip_gen: v5e
topology: v5e:2x2
jax: 0.10.0
libtpu: 0.0.40
codegen_flags: <defaults>
</compile_context>

<pallas_src>
import math

import jax
import jax.numpy as jnp
from jax.experimental import pallas as pl
from jax.experimental.pallas import tpu as pltpu


# ---------------------------------------------------------------------------
# Pallas kernel: per (batch, node-tile) bilinear scores against the summary u.
# ---------------------------------------------------------------------------
def _disc_score_kernel(u_ref, hpl_ref, hmi_ref, o1_ref, o2_ref):
    # u_ref:   (1, 1, n_h)   f32  (u[b] = W @ c[b], precomputed in the wrapper)
    # hpl_ref: (1, TN, n_h)
    # hmi_ref: (1, TN, n_h)
    # o1_ref:  (1, TN, 1)
    # o2_ref:  (1, TN, 1)
    u = u_ref[0].astype(jnp.float32)          # (1, n_h), broadcast over sublanes
    hpl = hpl_ref[0].astype(jnp.float32)      # (TN, n_h)
    hmi = hmi_ref[0].astype(jnp.float32)

    # Memory-bound batched matvec on VPU (+ XLU lane reduce); f32 accumulation.
    sc1 = jnp.sum(hpl * u, axis=-1, keepdims=True)   # (TN, 1)
    sc2 = jnp.sum(hmi * u, axis=-1, keepdims=True)   # (TN, 1)

    o1_ref[0] = sc1.astype(o1_ref.dtype)
    o2_ref[0] = sc2.astype(o2_ref.dtype)


def _choose_node_tile(n, n_h, itemsize, vmem_budget_bytes=20 << 20, max_tile=2048):
    """Largest node tile such that 2 h inputs x 2 pipeline buffers fit the budget.

    The budget (~20 MiB) plus the tiny u/output buffers stays under the 32 MiB
    scoped VMEM we request, which is safe on v5e/v6e (128 MiB physical) and
    v7x (64 MiB physical)."""
    per_row = 2 * 2 * n_h * itemsize
    cap = max((vmem_budget_bytes // per_row) // 128 * 128, 128)
    tile = int(min(max_tile, cap))
    if n <= tile:
        return n, n                      # single tile: block == full node dim
    n_pad = ((n + tile - 1) // tile) * tile
    return tile, n_pad


# ---------------------------------------------------------------------------
# Discriminator forward (Bilinear scoring) built around the Pallas kernel.
# ---------------------------------------------------------------------------
def discriminator_forward(c, h_pl, h_mi, weight, bias,
                          s_bias1=None, s_bias2=None, *, node_tile=None):
    """c: (B, n_h); h_pl/h_mi: (B, N, n_h); weight: (n_h, n_h); bias: scalar.

    Returns logits of shape (B, 2N) in float32."""
    B, N, n_h = h_pl.shape
    assert h_mi.shape == (B, N, n_h)
    assert c.shape == (B, n_h)
    assert weight.shape == (n_h, n_h)

    # (1) Hoist the summary projection: u[b, i] = sum_j W[i, j] * c[b, j].
    #     One proper-shaped matmul instead of B degenerate M=1 matmuls in-grid.
    u = jnp.dot(c.astype(jnp.float32), weight.astype(jnp.float32).T)   # (B, n_h)
    u3 = u.reshape(B, 1, n_h)

    # (2) Tile the node dimension; pad N up to a tile multiple if needed.
    itemsize = jnp.dtype(h_pl.dtype).itemsize
    if node_tile is None:
        tn, n_pad = _choose_node_tile(N, n_h, itemsize)
    else:
        tn = int(node_tile)
        n_pad = ((N + tn - 1) // tn) * tn
    if n_pad != N:
        pad = ((0, 0), (0, n_pad - N), (0, 0))
        h_pl = jnp.pad(h_pl, pad)
        h_mi = jnp.pad(h_mi, pad)
    grid = (B, n_pad // tn)

    out_sds = jax.ShapeDtypeStruct((B, n_pad, 1), jnp.float32)

    sc1, sc2 = pl.pallas_call(
        _disc_score_kernel,
        out_shape=(out_sds, out_sds),
        grid_spec=pltpu.PrefetchScalarGridSpec(
            num_scalar_prefetch=0,
            grid=grid,
            in_specs=[
                pl.BlockSpec((1, 1, n_h), lambda b, n: (b, 0, 0)),    # u
                pl.BlockSpec((1, tn, n_h), lambda b, n: (b, n, 0)),   # h_pl tile
                pl.BlockSpec((1, tn, n_h), lambda b, n: (b, n, 0)),   # h_mi tile
            ],
            out_specs=(
                pl.BlockSpec((1, tn, 1), lambda b, n: (b, n, 0)),     # sc1 tile
                pl.BlockSpec((1, tn, 1), lambda b, n: (b, n, 0)),     # sc2 tile
            ),
        ),
        compiler_params=pltpu.CompilerParams(
            dimension_semantics=("parallel", "parallel"),
            vmem_limit_bytes=32 * 1024 * 1024,
        ),
    )(u3, h_pl, h_mi)

    # Tiny epilogue in plain XLA: drop N-padding, add scalar Bilinear bias and
    # optional sample biases, concatenate positive/negative scores.
    b = jnp.asarray(bias, jnp.float32)
    sc1 = sc1.reshape(B, n_pad)[:, :N] + b
    sc2 = sc2.reshape(B, n_pad)[:, :N] + b
    if s_bias1 is not None:
        sc1 = sc1 + s_bias1
    if s_bias2 is not None:
        sc2 = sc2 + s_bias2
    return jnp.concatenate([sc1, sc2], axis=1)


# ---------------------------------------------------------------------------
# DGI forward = AvgReadout -> sigmoid -> Discriminator.
# ---------------------------------------------------------------------------
def avg_readout(seq, msk=None):
    # Matches torch AvgReadout: masked sum divided by the *global* mask sum.
    if msk is None:
        return jnp.mean(seq, axis=1)
    m = msk[..., None].astype(seq.dtype)
    return jnp.sum(seq * m, axis=1) / jnp.sum(msk)


def dgi_forward(seq1_top, seq2_top, msk, weight, bias,
                samp_bias1=None, samp_bias2=None, *, node_tile=None):
    # Readout + sigmoid are cheap reductions; kept as plain-XLA glue (they fuse),
    # the HBM-bound bilinear scoring runs in the Pallas kernel.
    c = jax.nn.sigmoid(avg_readout(seq1_top, msk))
    return discriminator_forward(c, seq1_top, seq2_top, weight, bias,
                                 samp_bias1, samp_bias2, node_tile=node_tile)


def init_discriminator_params(key, n_h):
    """Xavier-uniform weight (torch fan calc for the (1, n_h, n_h) Bilinear
    weight: fan_in = n_h*n_h, fan_out = n_h), zero bias."""
    fan_in = n_h * n_h
    fan_out = n_h
    bound = math.sqrt(6.0 / (fan_in + fan_out))
    w = jax.random.uniform(key, (n_h, n_h), jnp.float32, -bound, bound)
    b = jnp.float32(0.0)
    return w, b


# ---------------------------------------------------------------------------
# Pure-JAX reference for validation.
# ---------------------------------------------------------------------------
def _reference_dgi(seq1, seq2, msk, weight, bias, s_bias1=None, s_bias2=None):
    if msk is None:
        c = jnp.mean(seq1, axis=1)
    else:
        c = jnp.sum(seq1 * msk[..., None], axis=1) / jnp.sum(msk)
    c = jax.nn.sigmoid(c)
    u = jnp.einsum("bj,ij->bi", c, weight)
    sc1 = jnp.einsum("bni,bi->bn", seq1, u) + bias
    sc2 = jnp.einsum("bni,bi->bn", seq2, u) + bias
    if s_bias1 is not None:
        sc1 = sc1 + s_bias1
    if s_bias2 is not None:
        sc2 = sc2 + s_bias2
    return jnp.concatenate([sc1, sc2], axis=1)


if __name__ == "__main__":
    # --- small toy shape consistent with the module ---
    B, N, n_h = 2, 8, 32
    key = jax.random.PRNGKey(0)
    k_w, k_1, k_2, k_m = jax.random.split(key, 4)

    weight, bias = init_discriminator_params(k_w, n_h)
    seq1 = jax.random.normal(k_1, (B, N, n_h), jnp.float32)
    seq2 = jax.random.normal(k_2, (B, N, n_h), jnp.float32)

    # 1) msk=None path (DGI.forward default usage).
    logits = jax.block_until_ready(dgi_forward(seq1, seq2, None, weight, bias))
    expected = _reference_dgi(seq1, seq2, None, weight, bias)
    assert logits.shape == (B, 2 * N), logits.shape
    assert jnp.allclose(logits, expected, atol=1e-4, rtol=1e-4), (
        float(jnp.max(jnp.abs(logits - expected))))

    # 2) Masked readout + sample biases.
    msk = (jax.random.uniform(k_m, (B, N)) > 0.3).astype(jnp.float32)
    sb1 = 0.1 * jax.random.normal(jax.random.PRNGKey(1), (B, N), jnp.float32)
    sb2 = 0.1 * jax.random.normal(jax.random.PRNGKey(2), (B, N), jnp.float32)
    logits2 = jax.block_until_ready(
        dgi_forward(seq1, seq2, msk, weight, bias, sb1, sb2))
    expected2 = _reference_dgi(seq1, seq2, msk, weight, bias, sb1, sb2)
    assert jnp.allclose(logits2, expected2, atol=1e-4, rtol=1e-4), (
        float(jnp.max(jnp.abs(logits2 - expected2))))

    # 3) Multi-tile + padded-N path (exercises grid=(B, N_pad//TN) and padding).
    B2, N2, nh2 = 1, 320, 128
    kk = jax.random.split(jax.random.PRNGKey(3), 3)
    w2, b2 = init_discriminator_params(kk[0], nh2)
    s1 = jax.random.normal(kk[1], (B2, N2, nh2), jnp.float32)
    s2 = jax.random.normal(kk[2], (B2, N2, nh2), jnp.float32)
    out3 = jax.block_until_ready(dgi_forward(s1, s2, None, w2, b2, node_tile=128))
    exp3 = _reference_dgi(s1, s2, None, w2, b2)
    assert out3.shape == (B2, 2 * N2), out3.shape
    assert jnp.allclose(out3, exp3, atol=2e-4, rtol=2e-4), (
        float(jnp.max(jnp.abs(out3 - exp3))))

    print("KERNEL_OK")
</pallas_src>

<mosaic_0001>
module attributes {stable_mosaic.version = 11 : i64} {
  func.func @_disc_score_kernel(%arg0: i32, %arg1: i32, %arg2: memref<1x1x32xf32, #tpu.memory_space<vmem>>, %arg3: memref<1x8x32xf32, #tpu.memory_space<vmem>>, %arg4: memref<1x8x32xf32, #tpu.memory_space<vmem>>, %arg5: memref<1x8x1xf32, #tpu.memory_space<vmem>>, %arg6: memref<1x8x1xf32, #tpu.memory_space<vmem>>) attributes {dimension_semantics = [#tpu.dimension_semantics<parallel>, #tpu.dimension_semantics<parallel>], iteration_bounds = array<i64: 2, 1>, scalar_prefetch = 0 : i64, scratch_operands = 0 : i64, tpu.core_type = #tpu.core_type<tc>, window_params = [{transform_indices = @transform_0, window_bounds = array<i64: 1, 1, 32>}, {transform_indices = @transform_1, window_bounds = array<i64: 1, 8, 32>}, {transform_indices = @transform_2, window_bounds = array<i64: 1, 8, 32>}, {transform_indices = @transform_3, window_bounds = array<i64: 1, 8, 1>}, {transform_indices = @transform_4, window_bounds = array<i64: 1, 8, 1>}]} {
    %c0 = arith.constant 0 : index
    %c0_0 = arith.constant 0 : index
    %c0_1 = arith.constant 0 : index
    %0 = vector.load %arg2[%c0, %c0_0, %c0_1] : memref<1x1x32xf32, #tpu.memory_space<vmem>>, vector<1x1x32xf32>
    %1 = vector.shape_cast %0 : vector<1x1x32xf32> to vector<1x32xf32>
    %c0_2 = arith.constant 0 : index
    %c0_3 = arith.constant 0 : index
    %c0_4 = arith.constant 0 : index
    %2 = vector.load %arg3[%c0_2, %c0_3, %c0_4] : memref<1x8x32xf32, #tpu.memory_space<vmem>>, vector<1x8x32xf32>
    %3 = vector.shape_cast %2 : vector<1x8x32xf32> to vector<8x32xf32>
    %c0_5 = arith.constant 0 : index
    %c0_6 = arith.constant 0 : index
    %c0_7 = arith.constant 0 : index
    %4 = vector.load %arg4[%c0_5, %c0_6, %c0_7] : memref<1x8x32xf32, #tpu.memory_space<vmem>>, vector<1x8x32xf32>
    %5 = vector.shape_cast %4 : vector<1x8x32xf32> to vector<8x32xf32>
    %6 = vector.broadcast %1 : vector<1x32xf32> to vector<8x32xf32>
    %7 = arith.mulf %3, %6 : vector<8x32xf32>
    %cst = arith.constant dense<0.000000e+00> : vector<8xf32>
    %8 = vector.multi_reduction <add>, %7, %cst [1] : vector<8x32xf32> to vector<8xf32>
    %9 = vector.shape_cast %8 : vector<8xf32> to vector<8x1xf32>
    %10 = vector.broadcast %1 : vector<1x32xf32> to vector<8x32xf32>
    %11 = arith.mulf %5, %10 : vector<8x32xf32>
    %cst_8 = arith.constant dense<0.000000e+00> : vector<8xf32>
    %12 = vector.multi_reduction <add>, %11, %cst_8 [1] : vector<8x32xf32> to vector<8xf32>
    %13 = vector.shape_cast %12 : vector<8xf32> to vector<8x1xf32>
    %c0_9 = arith.constant 0 : index
    %c0_10 = arith.constant 0 : index
    %c0_11 = arith.constant 0 : index
    %14 = vector.load %arg5[%c0_9, %c0_10, %c0_11] : memref<1x8x1xf32, #tpu.memory_space<vmem>>, vector<1x8x1xf32>
    %15 = vector.shape_cast %14 : vector<1x8x1xf32> to vector<8x1xf32>
    %16 = vector.shape_cast %9 : vector<8x1xf32> to vector<1x8x1xf32>
    tpu.vector_store %arg5[%c0_9, %c0_10, %c0_11], %16 {strides = array<i32>} : memref<1x8x1xf32, #tpu.memory_space<vmem>>, vector<1x8x1xf32>,
    %c0_12 = arith.constant 0 : index
    %c0_13 = arith.constant 0 : index
    %c0_14 = arith.constant 0 : index
    %17 = vector.load %arg6[%c0_12, %c0_13, %c0_14] : memref<1x8x1xf32, #tpu.memory_space<vmem>>, vector<1x8x1xf32>
    %18 = vector.shape_cast %17 : vector<1x8x1xf32> to vector<8x1xf32>
    %19 = vector.shape_cast %13 : vector<8x1xf32> to vector<1x8x1xf32>
    tpu.vector_store %arg6[%c0_12, %c0_13, %c0_14], %19 {strides = array<i32>} : memref<1x8x1xf32, #tpu.memory_space<vmem>>, vector<1x8x1xf32>,
    return
  }
  func.func @transform_0(%arg0: i32, %arg1: i32) -> (i32, i32, i32) {
    %c0_i32 = arith.constant 0 : i32
    %c0_i32_0 = arith.constant 0 : i32
    %c0_i32_1 = arith.constant 0 : i32
    return %arg0, %c0_i32, %c0_i32_0 : i32, i32, i32
  }
  func.func @transform_1(%arg0: i32, %arg1: i32) -> (i32, i32, i32) {
    %c0_i32 = arith.constant 0 : i32
    %c0_i32_0 = arith.constant 0 : i32
    return %arg0, %arg1, %c0_i32 : i32, i32, i32
  }
  func.func @transform_2(%arg0: i32, %arg1: i32) -> (i32, i32, i32) {
    %c0_i32 = arith.constant 0 : i32
    %c0_i32_0 = arith.constant 0 : i32
    return %arg0, %arg1, %c0_i32 : i32, i32, i32
  }
  func.func @transform_3(%arg0: i32, %arg1: i32) -> (i32, i32, i32) {
    %c0_i32 = arith.constant 0 : i32
    %c0_i32_0 = arith.constant 0 : i32
    return %arg0, %arg1, %c0_i32 : i32, i32, i32
  }
  func.func @transform_4(%arg0: i32, %arg1: i32) -> (i32, i32, i32) {
    %c0_i32 = arith.constant 0 : i32
    %c0_i32_0 = arith.constant 0 : i32
    return %arg0, %arg1, %c0_i32 : i32, i32, i32
  }
}

</mosaic_0001>

<bundles_post_ra>
// kernel: tpu_custom_call.1
= control target key start
LH: loop header
LB: loop body
LE: loop exit
PB: predicated region body
PF: predicated region fallthrough
CT: control target
= control target key end

     0   :  { %10 = vsyncpa [#allocation3], 0  ;;  %s883_s0 = inlined_call_operand.hbm [shape: f32[2,1,32], index: 0, kind: input, shape index: {}]   ;;  %s884_s1 = inlined_call_operand.hbm [shape: f32[2,8,32], index: 1, kind: input, shape index: {}]   ;;  %s885_s2 = inlined_call_operand.hbm [shape: f32[2,8,32], index: 2, kind: input, shape index: {}]   ;;  %s886_s3 = inlined_call_operand.vmem [shape: f32[2,8,1], index: 3, kind: output, shape index: {0}]   ;;  %s887_s4 = inlined_call_operand.vmem [shape: f32[2,8,1], index: 4, kind: output, shape index: {1}]  }
   0x1   :  { %12 = vsyncpa [#allocation3 + $0x1], 0 }
   0x2   :  { %13 = vsyncpa [#allocation5], 0 }
   0x3   :  { %15 = vsyncpa [#allocation5 + $0x1], 0  ;;  %s766_s15 = smov 0   ;;  %s768_s16 = smov 0  }
   0x4   :  { %s770_s17 = smov 0   ;;  %s772_s18 = smov 0  }
   0x5   :  { %s774_s19 = smov 0   ;;  %s776_s20 = smov 0  }
   0x6 LB: > { %s514_s21 = sadd.s32 4294967295, %s739_s20   ;;  %s33_s22 = sadd.s32 1, %s735_s19  ;;  %s739_s20 = sphi %s776_s20, %s21_s20   ;;  %s735_s19 = sphi %s774_s19, %s895_s19   ;;  %s731_s18 = sphi %s772_s18, %s894_s18   ;;  %s727_s17 = sphi %s770_s17, %s893_s17   ;;  %s723_s16 = sphi %s768_s16, %s892_s16   ;;  %s719_s15 = sphi %s766_s15, %s891_s15  }
   0x7   : > { %p35_p0 = scmp.ge.s32.totalorder %s33_s22, 2  ;;  %s40_s23 = sadd.s32 1, %s727_s17 }
   0x8   : > { %p47_p1 = scmp.ne.s32.totalorder %s727_s17, %s723_s16  ;;  %p48_p2 = scmp.eq.s32.totalorder %s739_s20, 0 }
   0x9   : > { %s897_s22 = smov (%p35_p0, %s33_s22), 0  ;;  %p53_p4 = scmp.ne.s32.totalorder %s723_s16, %s719_s15 }
   0xa   : > { %p49_p3 = por %p48_p2, %p47_p1  ;;  %s37_s24 = ssub.s32 %s735_s19, %s897_s22 }
   0xb   : > { %p54_p5 = scmp.eq.s32.totalorder %s514_s21, 0  ;;  %p38_p6 = scmp.eq.s32.totalorder %s37_s24, 0 }
   0xc   : > { %p545_p8 = scmp.lt.s32.totalorder %s739_s20, 2  ;;  %s189_s27 = sand.u32 1, %s727_s17  }
   0xd   : > { %p807_p7 = por %p54_p5, %p53_p4  ;;  %s206_s29 = sand.u32 1, %s739_s20  }
   0xe   : > { %s813_s26 = scalar_select %p38_p6, %s727_s17, %s40_s23  }
   0xf   : > { %p816_p9 = pnand %p545_p8, %p49_p3  ;;  %s518_s30 = sshll.u32 %s189_s27, 3 }
  0x10   : > { %s519_s5 = sshll.u32 %s735_s19, 3  ;;  %s210_s9 = scalar_lea.vmem [#allocation4], %s518_s30 }
  0x11   : > { %s215_s8 = scalar_lea.hbm %s884_s1, %s519_s5  ;;  %s219_s10 = sshll.u32 %s210_s9, 4  ;;  %s220_s10 = int_to_ptr.vmem [resolvable:$true] %s219_s10 }
  0x12   : > { %s217_s11 = sshll.u32 %s215_s8, 4  ;;  %s207_s12 = scalar_lea.sflag [#allocation5], %s206_s29  ;;  %s218_s11 = int_to_ptr.hbm [resolvable:$true] %s217_s11 }
  0x13   : > { %541 = dma.hbm_to_vmem [thread:$0]  (!%p816_p9), %s218_s11, 128, %s220_s10, %s207_s12  }
  0x14   : > { %s235_s15 = scalar_lea.hbm %s885_s2, %s519_s5  ;;  %p522_p10 = scmp.ge.s32.totalorder %s739_s20, 1 }
  0x15   : > { %p244_p11 = scmp.lt.s32.totalorder %s739_s20, 3  ;;  %s195_s7 = scalar_lea.hbm %s883_s0, %s735_s19 }
  0x16   : > { %s192_s8 = scalar_lea.vmem [#allocation2], %s189_s27  ;;  %s197_s29 = sshll.u32 %s195_s7, 4  ;;  %s198_s29 = int_to_ptr.hbm [resolvable:$true] %s197_s29 }
  0x17   : > { %p832_p12 = pnand %p522_p10, %p244_p11  ;;  %s199_s9 = sshll.u32 %s192_s8, 4  ;;  %s200_s9 = int_to_ptr.vmem [resolvable:$true] %s199_s9 }
  0x18   : > { %s237_s10 = sshll.u32 %s235_s15, 4  ;;  %s190_s11 = scalar_lea.sflag [#allocation3], %s189_s27  ;;  %s238_s10 = int_to_ptr.hbm [resolvable:$true] %s237_s10 }
  0x19   : > { %538 = dma.hbm_to_vmem [thread:$0]  (!%p816_p9), %s198_s29, 16, %s200_s9, %s190_s11  }
  0x1a   : > { %s230_s5 = scalar_lea.vmem [#allocation6], %s518_s30  ;;  %248 = sbr.rel (%p832_p12) target bundleno = 164 (0xa4), region = 32 }
  0x1b   : > { %s239_s13 = sshll.u32 %s230_s5, 4  ;;  %s250_s14 = sand.u32 (!%p832_p12), 1, %s723_s16   ;;  %s240_s13 = int_to_ptr.vmem [resolvable:$true] %s239_s13 }
  0x1c   : > { %544 = dma.hbm_to_vmem [thread:$0]  (!%p816_p9), %s238_s10, 128, %s240_s13, %s207_s12  }
  0x1d   : > { %s251_s24 = scalar_lea.sflag (!%p832_p12), [#allocation3], %s250_s14  ;;  %s253_s6 = scalar_lea.vmem (!%p832_p12), [#allocation2], %s250_s14 }
  0x1f   : > { %710 = dma.done.wait (%p807_p7), %s251_s24, 16  }
  0x20   : > { %712 = vsyncadd (%p807_p7), %s251_s24, 4294967280  ;;  %s259_s27 = sand.u32 1, %s514_s21   ;;  %s523_s30 = sshll.u32 %s250_s14, 3 }
  0x21   : > { %s260_s28 = scalar_lea.sflag [#allocation5], %s259_s27  ;;  %s263_s12 = scalar_lea.vmem [#allocation4], %s523_s30 }
  0x22   : > { %714 = dma.done.wait (%p807_p7), %s260_s28, 256  }
  0x23   : > { %716 = vsyncadd (%p807_p7), %s260_s28, 4294967040  ;;  %v332_v0 = vld [vmem:[%s263_s12] sm:$0xff]  ;;  %v594_v1 = vld [vmem:[%s253_s6] ss:$0 sm:$0xff]  ;;  %vm338_vm0 = vcmask 261120   ;;  %s273_s15 = scalar_lea.vmem [#allocation6], %s523_s30 }
  0x24   : > { %v337_v2 = vmul.f32 %v594_v1, %v332_v0  ;;  %v333_v3 = vld [vmem:[%s273_s15] sm:$0xff]  ;;  %p317_p13 = scmp.lt.s32.totalorder %s731_s18, 1  ;;  %vm346_vm1 = vcmask 7168  }
  0x25   : > { %v342_v5 = vmul.f32 %v594_v1, %v333_v3 }
  0x26   : > { %v339_v4 = vsel %vm338_vm0, %v337_v2, 0.0  ;;  %s899_s18 = smov (!%p317_p13, %s731_s18), 1 }
  0x27   : > { %340 = vadd.xlane.f32.xlu0 %v339_v4  ;;  %v343_v6 = vsel %vm338_vm0, %v342_v5, 0.0  ;;  %s525_s21 = sshll.u32 %s899_s18, 3 }
  0x28   : > { %s323_s25 = scalar_lea.vmem %s886_s3, %s525_s21  ;;  %s330_s29 = scalar_lea.vmem %s887_s4, %s525_s21 }
  0x2f   : > { %344 = vadd.xlane.f32.xlu0 %v343_v6 }
  0x9a   : > { %v341_v7 = vpop.xlane.xlu0 %340 }
  0x9b   : > { %347 = vst.msk [vmem:[%s323_s25] sm:$0xff] %vm346_vm1, %v341_v7 }
  0xa2   : > { %v345_v8 = vpop.xlane.xlu0 %344 }
  0xa3   : > { %348 = vst.msk [vmem:[%s330_s29] sm:$0xff] %vm346_vm1, %v345_v8 }
  0xa4 PF: > { %s21_s20 = sadd.s32 1, %s739_s20   ;;  %s891_s15 = smov %s723_s16 }
  0xa5   : > { %p18_p0 = scmp.ge.s32.totalorder %s21_s20, 4   ;;  %s892_s16 = smov %s727_s17 }
  0xa6   : > { %s893_s17 = smov %s813_s26  ;;  %s894_s18 = smov %s735_s19 }
  0xa7   : > { %s895_s19 = smov %s897_s22  ;;  %20 = sbr.rel (!%p18_p0) target bundleno = 6 (0x6), region = 108 }
  0xac   :  { %394 = vsyncpa [#allocation3], 1 }
  0xad   :  { %396 = vsyncpa [#allocation3 + $0x1], 1 }
  0xae   :  { %397 = vsyncpa [#allocation5], 1 }
  0xaf   :  { %399 = vsyncpa [#allocation5 + $0x1], 1 }

</bundles_post_ra>
